<compile_context>
chip_gen: v5e
topology: v5e:2x2
jax: 0.10.0
libtpu: 0.0.40
codegen_flags: <defaults>
</compile_context>

<pallas_src>
import functools

import jax
import jax.numpy as jnp
from jax.experimental import pallas as pl
from jax.experimental.pallas import tpu as pltpu


IN_DIM = 28 * 28          # 784
H1, H2, H3 = 128, 64, 32
OUT_DIM = 10
OUT_PAD = 128             # lane-dense padded output width (unmasked vst)


def _round_up(a: int, m: int) -> int:
    return (a + m - 1) // m * m


def _cdiv(a: int, b: int) -> int:
    return -(-a // b)


def ffnn_kernel(x_ref, w1_ref, b1_ref, w2_ref, b2_ref,
                w3_ref, b3_ref, w4_ref, b4_ref, o_ref):
    """One batch tile: 4 matmuls (bf16 operands, f32 accumulation) + bias + ReLU.

    x_ref is already bf16; biases are f32; output stored bf16 (f32 accumulate).
    """
    x = x_ref[...]                                                       # [tB, 784] bf16
    h1 = jnp.dot(x, w1_ref[...], preferred_element_type=jnp.float32) + b1_ref[...]
    h1 = jnp.maximum(h1, 0.0)                                            # [tB, 128] f32
    h2 = jnp.dot(h1.astype(jnp.bfloat16), w2_ref[...],
                 preferred_element_type=jnp.float32) + b2_ref[...]
    h2 = jnp.maximum(h2, 0.0)                                            # [tB, 64]  f32
    h3 = jnp.dot(h2.astype(jnp.bfloat16), w3_ref[...],
                 preferred_element_type=jnp.float32) + b3_ref[...]
    h3 = jnp.maximum(h3, 0.0)                                            # [tB, 32]  f32
    h4 = jnp.dot(h3.astype(jnp.bfloat16), w4_ref[...],
                 preferred_element_type=jnp.float32) + b4_ref[...]       # [tB, 128] f32
    o_ref[...] = h4.astype(o_ref.dtype)                                  # bf16 store


def _choose_tile(batch: int, max_tile_b: int) -> int:
    """Adaptive batch tile: <= max_tile_b, multiple of 8, padding waste capped,
    and >= 2 grid steps whenever possible so both v7x TensorCores get tiles."""
    n_tiles = max(_cdiv(batch, max_tile_b), 1)
    if batch >= 16:                     # can form at least two 8-row tiles
        n_tiles = max(n_tiles, 2)
    return _round_up(_cdiv(batch, n_tiles), 8)


def _vmem_limit_bytes(tile_b: int) -> int:
    """Explicit VMEM budget from the real footprint (portable to v7x's 64 MiB)."""
    buf = 2 * tile_b * IN_DIM * 2 + 2 * tile_b * OUT_PAD * 2      # dbl-buffered x / out (bf16)
    weights = 2 * (IN_DIM * H1 + H1 * H2 + H2 * H3 + H3 * OUT_PAD) * 2
    inter = tile_b * (H1 + H2 + H3 + OUT_PAD) * 6                 # f32 intermediates + bf16 copies
    limit = buf + weights + inter + (6 << 20)                     # compiler scratch headroom
    return int(min(max(limit, 8 << 20), 28 << 20))


@functools.partial(jax.jit, static_argnames=("max_tile_b", "return_padded"))
def ffnn_forward(x, params, *, max_tile_b: int = 1024, return_padded: bool = False):
    """x: [B, 1, 28, 28] (NCHW) or [B, 784], ideally bf16. Returns [B, 10] f32
    (or the padded bf16 [B_pad, 128] slab if return_padded=True for fused consumers)."""
    w1, b1, w2, b2, w3, b3, w4, b4 = params

    x2d = x.reshape(-1, IN_DIM)                                   # x.view(-1, 784)
    if x2d.dtype != jnp.bfloat16:
        # NOTE: this is an extra un-hidden HBM pass; producers should hand bf16.
        x2d = x2d.astype(jnp.bfloat16)
    B = x2d.shape[0]

    tile_b = _choose_tile(B, max_tile_b)
    b_pad = _round_up(B, tile_b)
    if b_pad != B:
        x2d = jnp.pad(x2d, ((0, b_pad - B), (0, 0)))
    grid_b = b_pad // tile_b

    # bf16 weights for the MXU; biases stay f32 (bias-add/ReLU on the VPU in f32).
    bf16 = jnp.bfloat16
    w1b, w2b, w3b = w1.astype(bf16), w2.astype(bf16), w3.astype(bf16)
    # Lane-dense final layer: pad the 10 output lanes up to 128 with zeros.
    w4b = jnp.zeros((H3, OUT_PAD), bf16).at[:, :OUT_DIM].set(w4.astype(bf16))
    b4p = jnp.zeros((1, OUT_PAD), jnp.float32).at[:, :OUT_DIM].set(b4)

    # Weights/biases: constant block index -> fetched once, resident across grid steps.
    resident = lambda shape: pl.BlockSpec(shape, lambda i: (0, 0))

    out_padded = pl.pallas_call(
        ffnn_kernel,
        out_shape=jax.ShapeDtypeStruct((b_pad, OUT_PAD), jnp.bfloat16),
        grid=(grid_b,),
        in_specs=[
            pl.BlockSpec((tile_b, IN_DIM), lambda i: (i, 0)),     # bf16 x tile, pipelined
            resident((IN_DIM, H1)), resident((1, H1)),
            resident((H1, H2)),     resident((1, H2)),
            resident((H2, H3)),     resident((1, H3)),
            resident((H3, OUT_PAD)), resident((1, OUT_PAD)),
        ],
        out_specs=pl.BlockSpec((tile_b, OUT_PAD), lambda i: (i, 0)),
        compiler_params=pltpu.CompilerParams(
            dimension_semantics=("parallel",),                    # shard batch across TCs (v7x)
            vmem_limit_bytes=_vmem_limit_bytes(tile_b),
        ),
    )(x2d, w1b, b1, w2b, b2, w3b, b3, w4b, b4p)

    if return_padded:
        # Let a downstream fused consumer (loss/softmax/argmax) slice internally.
        return out_padded
    return out_padded[:B, :OUT_DIM].astype(jnp.float32)


def init_params(key):
    """nn.Linear-shaped params, stored transposed as [in, out]; PyTorch-style
    uniform(-1/sqrt(fan_in), 1/sqrt(fan_in)) init. Kept in f32 (cast to bf16 at call)."""
    dims = [(IN_DIM, H1), (H1, H2), (H2, H3), (H3, OUT_DIM)]
    params = []
    for fan_in, fan_out in dims:
        key, kw, kb = jax.random.split(key, 3)
        bound = 1.0 / jnp.sqrt(jnp.float32(fan_in))
        w = jax.random.uniform(kw, (fan_in, fan_out), jnp.float32, -bound, bound)
        b = jax.random.uniform(kb, (1, fan_out), jnp.float32, -bound, bound)
        params.extend([w, b])
    return tuple(params)


def ref_forward(x, params):
    """Plain-JAX reference with the same bf16 operand / bf16-store rounding."""
    w1, b1, w2, b2, w3, b3, w4, b4 = params
    bf = lambda a: a.astype(jnp.bfloat16)
    h = x.reshape(-1, IN_DIM)
    h = jnp.maximum(jnp.dot(bf(h), bf(w1), preferred_element_type=jnp.float32) + b1, 0.0)
    h = jnp.maximum(jnp.dot(bf(h), bf(w2), preferred_element_type=jnp.float32) + b2, 0.0)
    h = jnp.maximum(jnp.dot(bf(h), bf(w3), preferred_element_type=jnp.float32) + b3, 0.0)
    w4p = jnp.zeros((H3, OUT_PAD), jnp.bfloat16).at[:, :OUT_DIM].set(bf(w4))
    b4p = jnp.zeros((1, OUT_PAD), jnp.float32).at[:, :OUT_DIM].set(b4)
    out = jnp.dot(bf(h), w4p, preferred_element_type=jnp.float32) + b4p
    return out.astype(jnp.bfloat16)[:, :OUT_DIM].astype(jnp.float32)


if __name__ == "__main__":
    key = jax.random.PRNGKey(0)
    key, kx = jax.random.split(key)

    params = init_params(key)
    # Small batch, MNIST-like NCHW input, produced directly in bf16 so the kernel
    # consumes bf16 without an extra cast pass. B=8 exercises the adaptive tile.
    x = jax.random.normal(kx, (8, 1, 28, 28), jnp.bfloat16)

    out = ffnn_forward(x, params)
    out = jax.block_until_ready(out)

    ref = ref_forward(x, params)
    assert out.shape == (8, OUT_DIM), out.shape
    assert jnp.allclose(out, ref, atol=2e-2, rtol=2e-2), \
        float(jnp.max(jnp.abs(out - ref)))

    print("KERNEL_OK")
</pallas_src>

<mosaic_0001>
module attributes {stable_mosaic.version = 11 : i64} {
  func.func @ffnn_kernel(%arg0: i32, %arg1: memref<8x784xbf16, #tpu.memory_space<vmem>>, %arg2: memref<784x128xbf16, #tpu.memory_space<vmem>>, %arg3: memref<1x128xf32, #tpu.memory_space<vmem>>, %arg4: memref<128x64xbf16, #tpu.memory_space<vmem>>, %arg5: memref<1x64xf32, #tpu.memory_space<vmem>>, %arg6: memref<64x32xbf16, #tpu.memory_space<vmem>>, %arg7: memref<1x32xf32, #tpu.memory_space<vmem>>, %arg8: memref<32x128xbf16, #tpu.memory_space<vmem>>, %arg9: memref<1x128xf32, #tpu.memory_space<vmem>>, %arg10: memref<8x128xbf16, #tpu.memory_space<vmem>>) attributes {dimension_semantics = [#tpu.dimension_semantics<parallel>], iteration_bounds = array<i64: 1>, scalar_prefetch = 0 : i64, scratch_operands = 0 : i64, tpu.core_type = #tpu.core_type<tc>, window_params = [{transform_indices = @transform_0, window_bounds = array<i64: 8, 784>}, {pipeline_mode = #tpu.pipeline_mode<synchronous>, transform_indices = @transform_1, window_bounds = array<i64: 784, 128>}, {pipeline_mode = #tpu.pipeline_mode<synchronous>, transform_indices = @transform_2, window_bounds = array<i64: 1, 128>}, {pipeline_mode = #tpu.pipeline_mode<synchronous>, transform_indices = @transform_3, window_bounds = array<i64: 128, 64>}, {pipeline_mode = #tpu.pipeline_mode<synchronous>, transform_indices = @transform_4, window_bounds = array<i64: 1, 64>}, {pipeline_mode = #tpu.pipeline_mode<synchronous>, transform_indices = @transform_5, window_bounds = array<i64: 64, 32>}, {pipeline_mode = #tpu.pipeline_mode<synchronous>, transform_indices = @transform_6, window_bounds = array<i64: 1, 32>}, {pipeline_mode = #tpu.pipeline_mode<synchronous>, transform_indices = @transform_7, window_bounds = array<i64: 32, 128>}, {pipeline_mode = #tpu.pipeline_mode<synchronous>, transform_indices = @transform_8, window_bounds = array<i64: 1, 128>}, {transform_indices = @transform_9, window_bounds = array<i64: 8, 128>}]} {
    %c0 = arith.constant 0 : index
    %c0_0 = arith.constant 0 : index
    %0 = vector.load %arg1[%c0, %c0_0] : memref<8x784xbf16, #tpu.memory_space<vmem>>, vector<8x784xbf16>
    %c0_1 = arith.constant 0 : index
    %c0_2 = arith.constant 0 : index
    %1 = vector.load %arg2[%c0_1, %c0_2] : memref<784x128xbf16, #tpu.memory_space<vmem>>, vector<784x128xbf16>
    %cst = arith.constant dense<0.000000e+00> : vector<8x128xf32>
    %2 = tpu.matmul %0, %1, %cst {dimension_numbers = #tpu.dot_dimension_numbers<[1], [0], [0], [1], [0, 0, 1, 1], [], []>} : vector<8x784xbf16>, vector<784x128xbf16>, vector<8x128xf32> -> vector<8x128xf32>
    %c0_3 = arith.constant 0 : index
    %c0_4 = arith.constant 0 : index
    %3 = vector.load %arg3[%c0_3, %c0_4] : memref<1x128xf32, #tpu.memory_space<vmem>>, vector<1x128xf32>
    %4 = vector.broadcast %3 : vector<1x128xf32> to vector<8x128xf32>
    %5 = arith.addf %2, %4 : vector<8x128xf32>
    %cst_5 = arith.constant 0.000000e+00 : f32
    %6 = vector.broadcast %cst_5 : f32 to vector<8x128xf32>
    %7 = arith.maximumf %5, %6 : vector<8x128xf32>
    %8 = arith.truncf %7 : vector<8x128xf32> to vector<8x128xbf16>
    %c0_6 = arith.constant 0 : index
    %c0_7 = arith.constant 0 : index
    %9 = vector.load %arg4[%c0_6, %c0_7] : memref<128x64xbf16, #tpu.memory_space<vmem>>, vector<128x64xbf16>
    %cst_8 = arith.constant dense<0.000000e+00> : vector<8x64xf32>
    %10 = tpu.matmul %8, %9, %cst_8 {dimension_numbers = #tpu.dot_dimension_numbers<[1], [0], [0], [1], [0, 0, 1, 1], [], []>} : vector<8x128xbf16>, vector<128x64xbf16>, vector<8x64xf32> -> vector<8x64xf32>
    %c0_9 = arith.constant 0 : index
    %c0_10 = arith.constant 0 : index
    %11 = vector.load %arg5[%c0_9, %c0_10] : memref<1x64xf32, #tpu.memory_space<vmem>>, vector<1x64xf32>
    %12 = vector.broadcast %11 : vector<1x64xf32> to vector<8x64xf32>
    %13 = arith.addf %10, %12 : vector<8x64xf32>
    %cst_11 = arith.constant 0.000000e+00 : f32
    %14 = vector.broadcast %cst_11 : f32 to vector<8x64xf32>
    %15 = arith.maximumf %13, %14 : vector<8x64xf32>
    %16 = arith.truncf %15 : vector<8x64xf32> to vector<8x64xbf16>
    %c0_12 = arith.constant 0 : index
    %c0_13 = arith.constant 0 : index
    %17 = vector.load %arg6[%c0_12, %c0_13] : memref<64x32xbf16, #tpu.memory_space<vmem>>, vector<64x32xbf16>
    %cst_14 = arith.constant dense<0.000000e+00> : vector<8x32xf32>
    %18 = tpu.matmul %16, %17, %cst_14 {dimension_numbers = #tpu.dot_dimension_numbers<[1], [0], [0], [1], [0, 0, 1, 1], [], []>} : vector<8x64xbf16>, vector<64x32xbf16>, vector<8x32xf32> -> vector<8x32xf32>
    %c0_15 = arith.constant 0 : index
    %c0_16 = arith.constant 0 : index
    %19 = vector.load %arg7[%c0_15, %c0_16] : memref<1x32xf32, #tpu.memory_space<vmem>>, vector<1x32xf32>
    %20 = vector.broadcast %19 : vector<1x32xf32> to vector<8x32xf32>
    %21 = arith.addf %18, %20 : vector<8x32xf32>
    %cst_17 = arith.constant 0.000000e+00 : f32
    %22 = vector.broadcast %cst_17 : f32 to vector<8x32xf32>
    %23 = arith.maximumf %21, %22 : vector<8x32xf32>
    %24 = arith.truncf %23 : vector<8x32xf32> to vector<8x32xbf16>
    %c0_18 = arith.constant 0 : index
    %c0_19 = arith.constant 0 : index
    %25 = vector.load %arg8[%c0_18, %c0_19] : memref<32x128xbf16, #tpu.memory_space<vmem>>, vector<32x128xbf16>
    %cst_20 = arith.constant dense<0.000000e+00> : vector<8x128xf32>
    %26 = tpu.matmul %24, %25, %cst_20 {dimension_numbers = #tpu.dot_dimension_numbers<[1], [0], [0], [1], [0, 0, 1, 1], [], []>} : vector<8x32xbf16>, vector<32x128xbf16>, vector<8x128xf32> -> vector<8x128xf32>
    %c0_21 = arith.constant 0 : index
    %c0_22 = arith.constant 0 : index
    %27 = vector.load %arg9[%c0_21, %c0_22] : memref<1x128xf32, #tpu.memory_space<vmem>>, vector<1x128xf32>
    %28 = vector.broadcast %27 : vector<1x128xf32> to vector<8x128xf32>
    %29 = arith.addf %26, %28 : vector<8x128xf32>
    %30 = arith.truncf %29 : vector<8x128xf32> to vector<8x128xbf16>
    %c0_23 = arith.constant 0 : index
    %c0_24 = arith.constant 0 : index
    %31 = vector.load %arg10[%c0_23, %c0_24] : memref<8x128xbf16, #tpu.memory_space<vmem>>, vector<8x128xbf16>
    tpu.vector_store %arg10[%c0_23, %c0_24], %30 {strides = array<i32>} : memref<8x128xbf16, #tpu.memory_space<vmem>>, vector<8x128xbf16>,
    return
  }
  func.func @transform_0(%arg0: i32) -> (i32, i32) {
    %c0_i32 = arith.constant 0 : i32
    %c0_i32_0 = arith.constant 0 : i32
    return %arg0, %c0_i32 : i32, i32
  }
  func.func @transform_1(%arg0: i32) -> (i32, i32) {
    %c0_i32 = arith.constant 0 : i32
    %c0_i32_0 = arith.constant 0 : i32
    %c0_i32_1 = arith.constant 0 : i32
    return %c0_i32, %c0_i32_0 : i32, i32
  }
  func.func @transform_2(%arg0: i32) -> (i32, i32) {
    %c0_i32 = arith.constant 0 : i32
    %c0_i32_0 = arith.constant 0 : i32
    %c0_i32_1 = arith.constant 0 : i32
    return %c0_i32, %c0_i32_0 : i32, i32
  }
  func.func @transform_3(%arg0: i32) -> (i32, i32) {
    %c0_i32 = arith.constant 0 : i32
    %c0_i32_0 = arith.constant 0 : i32
    %c0_i32_1 = arith.constant 0 : i32
    return %c0_i32, %c0_i32_0 : i32, i32
  }
  func.func @transform_4(%arg0: i32) -> (i32, i32) {
    %c0_i32 = arith.constant 0 : i32
    %c0_i32_0 = arith.constant 0 : i32
    %c0_i32_1 = arith.constant 0 : i32
    return %c0_i32, %c0_i32_0 : i32, i32
  }
  func.func @transform_5(%arg0: i32) -> (i32, i32) {
    %c0_i32 = arith.constant 0 : i32
    %c0_i32_0 = arith.constant 0 : i32
    %c0_i32_1 = arith.constant 0 : i32
    return %c0_i32, %c0_i32_0 : i32, i32
  }
  func.func @transform_6(%arg0: i32) -> (i32, i32) {
    %c0_i32 = arith.constant 0 : i32
    %c0_i32_0 = arith.constant 0 : i32
    %c0_i32_1 = arith.constant 0 : i32
    return %c0_i32, %c0_i32_0 : i32, i32
  }
  func.func @transform_7(%arg0: i32) -> (i32, i32) {
    %c0_i32 = arith.constant 0 : i32
    %c0_i32_0 = arith.constant 0 : i32
    %c0_i32_1 = arith.constant 0 : i32
    return %c0_i32, %c0_i32_0 : i32, i32
  }
  func.func @transform_8(%arg0: i32) -> (i32, i32) {
    %c0_i32 = arith.constant 0 : i32
    %c0_i32_0 = arith.constant 0 : i32
    %c0_i32_1 = arith.constant 0 : i32
    return %c0_i32, %c0_i32_0 : i32, i32
  }
  func.func @transform_9(%arg0: i32) -> (i32, i32) {
    %c0_i32 = arith.constant 0 : i32
    %c0_i32_0 = arith.constant 0 : i32
    return %arg0, %c0_i32 : i32, i32
  }
}

</mosaic_0001>

<bundles_post_ra>
// kernel: ffnn_forward.1
= control target key start
LH: loop header
LB: loop body
LE: loop exit
PB: predicated region body
PF: predicated region fallthrough
CT: control target
= control target key end

     0   :  { %vm457_vm0 = vcmask 130048   ;;  %vm673_vm1 = vcmask 523264   ;;  %vm712_vm2 = vcmask 261120   ;;  %s1323_s1 = inlined_call_operand.vmem [shape: bf16[784,128], index: 1, kind: input, shape index: {}]   ;;  %s1324_s2 = inlined_call_operand.vmem [shape: f32[1,128], index: 2, kind: input, shape index: {}]   ;;  %s1325_s0 = inlined_call_operand.vmem [shape: bf16[8,784], index: 0, kind: input, shape index: {}]   ;;  %s1326_s4 = inlined_call_operand.vmem [shape: f32[1,64], index: 4, kind: input, shape index: {}]   ;;  %s1327_s3 = inlined_call_operand.vmem [shape: bf16[128,64], index: 3, kind: input, shape index: {}]   ;;  %s1328_s5 = inlined_call_operand.vmem [shape: bf16[64,32], index: 5, kind: input, shape index: {}]   ;;  %s1329_s6 = inlined_call_operand.vmem [shape: f32[1,32], index: 6, kind: input, shape index: {}]   ;;  %s1330_s7 = inlined_call_operand.vmem [shape: bf16[32,128], index: 7, kind: input, shape index: {}]   ;;  %s1331_s8 = inlined_call_operand.vmem [shape: f32[1,128], index: 8, kind: input, shape index: {}]   ;;  %s1332_s9 = inlined_call_operand.vmem [shape: bf16[8,128], index: 9, kind: output, shape index: {}]  }
   0x1   :  { %v997_v0 = vld [vmem:[%s1323_s1 + $0x38] sm:$0xff]  ;;  %v996_v3 = vld [vmem:[%s1323_s1 + $0x30] sm:$0xff]  ;;  %v995_v8 = vld [vmem:[%s1323_s1 + $0x28] sm:$0xff] }
   0x2   :  { %v1005_v1 = vld [vmem:[%s1323_s1 + $0x78] sm:$0xff]  ;;  %461 = vmatpush.bf16.msra.mxu0 %v997_v0  ;;  %v1004_v4 = vld [vmem:[%s1323_s1 + $0x70] sm:$0xff]  ;;  %v1003_v9 = vld [vmem:[%s1323_s1 + $0x68] sm:$0xff] }
   0x3   :  { %v1013_v2 = vld [vmem:[%s1323_s1 + $0xb8] sm:$0xff]  ;;  %474 = vmatpush.bf16.msra.mxu1 %v1005_v1  ;;  %v1012_v5 = vld [vmem:[%s1323_s1 + $0xb0] sm:$0xff]  ;;  %v1011_v10 = vld [vmem:[%s1323_s1 + $0xa8] sm:$0xff] }
   0x4   :  { %487 = vmatpush.bf16.msra.mxu2 %v1013_v2  ;;  %v1021_v6 = vld [vmem:[%s1323_s1 + $0xf8] sm:$0xff]  ;;  %v1020_v7 = vld [vmem:[%s1323_s1 + $0xf0] sm:$0xff]  ;;  %v1019_v11 = vld [vmem:[%s1323_s1 + $0xe8] sm:$0xff] }
   0x5   :  { %500 = vmatpush.bf16.msra.mxu3 %v1021_v6  ;;  %v994_v12 = vld [vmem:[%s1323_s1 + $0x20] sm:$0xff]  ;;  %v993_v16 = vld [vmem:[%s1323_s1 + $0x18] sm:$0xff]  ;;  %v992_v20 = vld [vmem:[%s1323_s1 + $0x10] sm:$0xff] }
   0x6   :  { %462 = vmatpush.bf16.msra.mxu0 %v996_v3  ;;  %v1002_v13 = vld [vmem:[%s1323_s1 + $0x60] sm:$0xff]  ;;  %v1001_v17 = vld [vmem:[%s1323_s1 + $0x58] sm:$0xff]  ;;  %v1000_v21 = vld [vmem:[%s1323_s1 + $0x50] sm:$0xff] }
   0x7   :  { %475 = vmatpush.bf16.msra.mxu1 %v1004_v4  ;;  %v1010_v14 = vld [vmem:[%s1323_s1 + $0xa0] sm:$0xff]  ;;  %v1009_v18 = vld [vmem:[%s1323_s1 + $0x98] sm:$0xff]  ;;  %v1008_v22 = vld [vmem:[%s1323_s1 + $0x90] sm:$0xff] }
   0x8   :  { %488 = vmatpush.bf16.msra.mxu2 %v1012_v5  ;;  %v1018_v15 = vld [vmem:[%s1323_s1 + $0xe0] sm:$0xff]  ;;  %v1017_v19 = vld [vmem:[%s1323_s1 + $0xd8] sm:$0xff]  ;;  %v1016_v23 = vld [vmem:[%s1323_s1 + $0xd0] sm:$0xff] }
   0x9   :  { %501 = vmatpush.bf16.msra.mxu3 %v1020_v7  ;;  %v991_v24 = vld [vmem:[%s1323_s1 + $0x8] sm:$0xff]  ;;  %v33_v26 = vld [vmem:[%s1325_s0] sm:$0xff]  ;;  %v1029_v34 = vld [vmem:[%s1323_s1 + $0x138] sm:$0xff] }
   0xa   :  { %463 = vmatpush.bf16.msra.mxu0 %v995_v8  ;;  %v999_v25 = vld [vmem:[%s1323_s1 + $0x48] sm:$0xff]  ;;  %v143_v29 = vunpack.c.l.b16 %v33_v26  ;;  %v144_v31 = vunpack.c.h.b16 %v33_v26  ;;  %v990_v32 = vld [vmem:[%s1323_s1] sm:$0xff]  ;;  %v1037_v35 = vld [vmem:[%s1323_s1 + $0x178] sm:$0xff] }
   0xb   :  { %476 = vmatpush.bf16.msra.mxu1 %v1003_v9  ;;  %v1007_v27 = vld [vmem:[%s1323_s1 + $0x88] sm:$0xff]  ;;  %v998_v33 = vld [vmem:[%s1323_s1 + $0x40] sm:$0xff]  ;;  %v1028_v43 = vld [vmem:[%s1323_s1 + $0x130] sm:$0xff] }
   0xc   :  { %489 = vmatpush.bf16.msra.mxu2 %v1011_v10  ;;  %v34_v28 = vld [vmem:[%s1325_s0 + $0x8] sm:$0xff]  ;;  %v1006_v36 = vld [vmem:[%s1323_s1 + $0x80] sm:$0xff]  ;;  %v150_v38 = vpack.c.b16 %v143_v29, %v143_v29  ;;  %v151_v39 = vpack.c.b16 %v144_v31, %v144_v31  ;;  %v1036_v44 = vld [vmem:[%s1323_s1 + $0x170] sm:$0xff] }
   0xd   :  { %502 = vmatpush.bf16.msra.mxu3 %v1019_v11  ;;  %v1015_v30 = vld [vmem:[%s1323_s1 + $0xc8] sm:$0xff]  ;;  %v145_v37 = vunpack.c.l.b16 %v34_v28  ;;  %v146_v40 = vunpack.c.h.b16 %v34_v28  ;;  %v1014_v41 = vld [vmem:[%s1323_s1 + $0xc0] sm:$0xff]  ;;  %v36_v51 = vld [vmem:[%s1325_s0 + $0x18] sm:$0xf] }
   0xe   :  { %464 = vmatpush.bf16.msra.mxu0 %v994_v12  ;;  %v1038_v42 = vld [vmem:[%s1323_s1 + $0x180] sm:$0xff]  ;;  %v1027_v47 = vld [vmem:[%s1323_s1 + $0x128] sm:$0xff]  ;;  %v1025_v52 = vld [vmem:[%s1323_s1 + $0x118] sm:$0xff]  ;;  %v149_v54 = vunpack.c.l.b16 %v36_v51 }
   0xf   :  { %477 = vmatpush.bf16.msra.mxu1 %v1002_v13  ;;  %v152_v45 = vpack.c.b16 %v145_v37, %v145_v37  ;;  %v153_v46 = vpack.c.b16 %v146_v40, %v146_v40  ;;  %v1035_v48 = vld [vmem:[%s1323_s1 + $0x168] sm:$0xff]  ;;  %v1026_v49 = vld [vmem:[%s1323_s1 + $0x120] sm:$0xff]  ;;  %v1033_v53 = vld [vmem:[%s1323_s1 + $0x158] sm:$0xff] }
  0x10   :  { %490 = vmatpush.bf16.msra.mxu2 %v1010_v14  ;;  %v1034_v50 = vld [vmem:[%s1323_s1 + $0x160] sm:$0xff]  ;;  %v1024_v55 = vld [vmem:[%s1323_s1 + $0x110] sm:$0xff]  ;;  %v156_v57 = vpack.c.b16 %v149_v54, %v149_v54  ;;  %v1023_v58 = vld [vmem:[%s1323_s1 + $0x108] sm:$0xff] }
  0x11   :  { %503 = vmatpush.bf16.msra.mxu3 %v1018_v15  ;;  %v1032_v56 = vld [vmem:[%s1323_s1 + $0x150] sm:$0xff]  ;;  %v1031_v59 = vld [vmem:[%s1323_s1 + $0x148] sm:$0xff]  ;;  %v1022_v63 = vld [vmem:[%s1323_s1 + $0x100] sm:$0xff] }
  0x12   :  { %465 = vmatpush.bf16.msra.mxu0 %v993_v16  ;;  %v35_v60 = vld [vmem:[%s1325_s0 + $0x10] sm:$0xff]  ;;  %v1030_v0 = vld [vmem:[%s1323_s1 + $0x140] sm:$0xff]  ;;  %v1046_v3 = vld [vmem:[%s1327_s3 + $0x38] sm:$0xff] }
  0x13   :  { %478 = vmatpush.bf16.msra.mxu1 %v1001_v17  ;;  %v147_v61 = vunpack.c.l.b16 %v35_v60  ;;  %v148_v62 = vunpack.c.h.b16 %v35_v60  ;;  %v1045_v4 = vld [vmem:[%s1327_s3 + $0x30] sm:$0xff]  ;;  %v1044_v5 = vld [vmem:[%s1327_s3 + $0x28] sm:$0xff]  ;;  %v1043_v6 = vld [vmem:[%s1327_s3 + $0x20] sm:$0xff] }
  0x14   :  { %491 = vmatpush.bf16.msra.mxu2 %v1009_v18  ;;  %v1042_v7 = vld [vmem:[%s1327_s3 + $0x18] sm:$0xff]  ;;  %v1041_v8 = vld [vmem:[%s1327_s3 + $0x10] sm:$0xff]  ;;  %v1040_v9 = vld [vmem:[%s1327_s3 + $0x8] sm:$0xff] }
  0x15   :  { %504 = vmatpush.bf16.msra.mxu3 %v1017_v19  ;;  %v154_v1 = vpack.c.b16 %v147_v61, %v147_v61  ;;  %v155_v2 = vpack.c.b16 %v148_v62, %v148_v62  ;;  %v1039_v12 = vld [vmem:[%s1327_s3] sm:$0xff]  ;;  %v1050_v15 = vld [vmem:[%s1328_s5 + $0x18] sm:$0xff]  ;;  %v1049_v18 = vld [vmem:[%s1328_s5 + $0x10] sm:$0xff] }
  0x16   :  { %466 = vmatpush.bf16.msra.mxu0 %v992_v20  ;;  %v1053_v19 = vld [vmem:[%s1324_s2] ss:$0 sm:$0xff]  ;;  %v1048_v20 = vld [vmem:[%s1328_s5 + $0x8] sm:$0xff] }
  0x17   :  { %479 = vmatpush.bf16.msra.mxu1 %v1000_v21  ;;  %v1051_v40 = vld [vmem:[%s1330_s7] sm:$0xff] }
  0x18   :  { %492 = vmatpush.bf16.msra.mxu2 %v1008_v22 }
  0x19   :  { %505 = vmatpush.bf16.msra.mxu3 %v1016_v23 }
  0x1a   :  { %467 = vmatpush.bf16.msra.mxu0 %v991_v24 }
  0x1b   :  { %480 = vmatpush.bf16.msra.mxu1 %v999_v25 }
  0x1c   :  { %493 = vmatpush.bf16.msra.mxu2 %v1007_v27 }
  0x1d   :  { %506 = vmatpush.bf16.msra.mxu3 %v1015_v30 }
  0x1e   :  { %468 = vmatpush.bf16.msra.mxu0 %v990_v32 }
  0x1f   :  { %481 = vmatpush.bf16.msra.mxu1 %v998_v33 }
  0x20   :  { %494 = vmatpush.bf16.msra.mxu2 %v1006_v36 }
  0x21   :  { %469 = vmatmul.bf16.vlgmr.msra.gmra.mxu0 %v150_v38  ;;  %507 = vmatpush.bf16.msra.mxu3 %v1014_v41  ;;  %v1047_v38 = vld [vmem:[%s1328_s5] sm:$0xff] }
  0x22   :  { %513 = vmatpush.bf16.msrb.mxu0 %v1029_v34  ;;  %482 = vmatmul.bf16.vlgmr.msra.gmra.mxu1 %v151_v39  ;;  %v1052_v39 = vld [vmem:[%s1330_s7 + $0x8] sm:$0xff]  ;;  %v1054_v41 = vld [vmem:[%s1326_s4] ss:$0 sm:$0xff] }
  0x23   :  { %526 = vmatpush.bf16.msrb.mxu1 %v1037_v35  ;;  %495 = vmatmul.bf16.vlgmr.msra.gmra.mxu2 %v152_v45 }
  0x24   :  { %546 = vmatpush.bf16.msrb.mxu2 %v1038_v42  ;;  %508 = vmatmul.bf16.vlgmr.msra.gmra.mxu3 %v153_v46 }
  0x25   :  { %622 = vmatpush.bf16.msrb.mxu3 %v1046_v3 }
  0x26   :  { %514 = vmatpush.bf16.msrb.mxu0 %v1028_v43 }
  0x27   :  { %527 = vmatpush.bf16.msrb.mxu1 %v1036_v44 }
  0x28   :  { %681 = vmatpush.bf16.msra.mxu2 %v1050_v15 }
  0x29   :  { %623 = vmatpush.bf16.msrb.mxu3 %v1045_v4 }
  0x2a   :  { %515 = vmatpush.bf16.msrb.mxu0 %v1027_v47  ;;  %v1055_v47 = vld [vmem:[%s1329_s6] ss:$0 sm:$0xff] }
  0x2b   :  { %528 = vmatpush.bf16.msrb.mxu1 %v1035_v48 }
  0x2c   :  { %682 = vmatpush.bf16.msra.mxu2 %v1049_v18 }
  0x2d   :  { %624 = vmatpush.bf16.msrb.mxu3 %v1044_v5 }
  0x2e   :  { %516 = vmatpush.bf16.msrb.mxu0 %v1026_v49 }
  0x2f   :  { %529 = vmatpush.bf16.msrb.mxu1 %v1034_v50 }
  0x30   :  { %683 = vmatpush.bf16.msra.mxu2 %v1048_v20 }
  0x31   :  { %625 = vmatpush.bf16.msrb.mxu3 %v1043_v6 }
  0x32   :  { %517 = vmatpush.bf16.msrb.mxu0 %v1025_v52 }
  0x33   :  { %530 = vmatpush.bf16.msrb.mxu1 %v1033_v53  ;;  %931 = vmatmul.msk.bf16.vlgmr.msrb.gmra.mxu2 %vm457_vm0, %v156_v57  ;;  %v1056_v53 = vld [vmem:[%s1331_s8] ss:$0 sm:$0xff] }
  0x34   :  { %684 = vmatpush.bf16.msra.mxu2 %v1047_v38 }
  0x35   :  { %626 = vmatpush.bf16.msrb.mxu3 %v1042_v7 }
  0x36   :  { %518 = vmatpush.bf16.msrb.mxu0 %v1024_v55 }
  0x37   :  { %531 = vmatpush.bf16.msrb.mxu1 %v1032_v56 }
  0x39   :  { %627 = vmatpush.bf16.msrb.mxu3 %v1041_v8 }
  0x3a   :  { %519 = vmatpush.bf16.msrb.mxu0 %v1023_v58 }
  0x3b   :  { %532 = vmatpush.bf16.msrb.mxu1 %v1031_v59 }
  0x3d   :  { %628 = vmatpush.bf16.msrb.mxu3 %v1040_v9 }
  0x3e   :  { %520 = vmatpush.bf16.msrb.mxu0 %v1022_v63 }
  0x3f   :  { %533 = vmatpush.bf16.msrb.mxu1 %v1030_v0 }
  0x41   :  { %521 = vmatmul.bf16.vlgmr.msrb.gmra.mxu0 %v154_v1  ;;  %629 = vmatpush.bf16.msrb.mxu3 %v1039_v12 }
  0x42   :  { %534 = vmatmul.bf16.vlgmr.msrb.gmra.mxu1 %v155_v2  ;;  %722 = vmatpush.bf16.msra.mxu0 %v1052_v39 }
  0x46   :  { %723 = vmatpush.bf16.msra.mxu0 %v1051_v40 }
  0x9e   :  { %v470_v10 = vpop.f32.mrf.mxu0 }
  0x9f   :  { %v483_v11 = vpop.f32.mrf.mxu1  ;;  %v471_v21 = vadd.f32 %v1053_v19, %v470_v10 }
  0xa1   :  { %v484_v24 = vadd.f32 %v483_v11, %v471_v21 }
  0xa6   :  { %v472_v13 = vpop.f32.mrf.mxu0  ;;  %v496_v16 = vpop.f32.mrf.mxu2 }
  0xa7   :  { %v485_v14 = vpop.f32.mrf.mxu1  ;;  %v509_v17 = vpop.f32.mrf.mxu3  ;;  %v497_v25 = vadd.f32 %v496_v16, %v484_v24 }
  0xa9   :  { %v510_v27 = vadd.f32 %v509_v17, %v497_v25 }
  0xae   :  { %v498_v22 = vpop.f32.mrf.mxu2 }
  0xaf   :  { %v511_v23 = vpop.f32.mrf.mxu3 }
  0xb6   :  { %v548_v26 = vpop.f32.mrf.mxu2 }
  0xbe   :  { %v522_v28 = vpop.f32.mrf.mxu0  ;;  %v550_v32 = vpop.f32.mrf.mxu2 }
  0xbf   :  { %v535_v29 = vpop.f32.mrf.mxu1  ;;  %v523_v30 = vadd.f32 %v522_v28, %v510_v27 }
  0xc1   :  { %v536_v31 = vadd.f32 %v535_v29, %v523_v30 }
  0xc3   :  { %v549_v33 = vadd.f32 %v548_v26, %v536_v31 }
  0xc5   :  { %v552_v34 = vmax.f32 %v549_v33, 0.0 }
  0xc6   :  { %v524_v35 = vpop.f32.mrf.mxu0 }
  0xc7   :  { %v537_v36 = vpop.f32.mrf.mxu1  ;;  %v553_v37 = vpack.c.bf16 %v552_v34, %v552_v34 }
  0xc9   :  { %630 = vmatmul.bf16.vlgmr.msrb.gmra.mxu3 %v553_v37 }
 0x14c   :  { %v631_v42 = vpop.f32.mrf.mxu3 }
 0x14d   :  { %v632_v43 = vadd.f32 %v1054_v41, %v631_v42 }
 0x14f   :  { %v635_v44 = vmax.f32 %v632_v43, 0.0 }
 0x151   :  { %v636_v45 = vpack.c.bf16 %v635_v44, %v635_v44 }
 0x153   :  { %980 = vmatmul.msk.bf16.vlgmr.msra.gmra.mxu2 %vm673_vm1, %v636_v45 }
 0x154   :  { %v633_v46 = vpop.f32.mrf.mxu3 }
 0x1d6   :  { %v686_v48 = vpop.f32.mrf.mxu2 }
 0x1d7   :  { %v687_v49 = vadd.f32 %v1055_v47, %v686_v48 }
 0x1d9   :  { %v690_v50 = vmax.f32 %v687_v49, 0.0 }
 0x1db   :  { %v691_v51 = vpack.c.bf16 %v690_v50, %v690_v50 }
 0x1dd   :  { %989 = vmatmul.msk.bf16.vlgmr.msra.gmra.mxu0 %vm712_vm2, %v691_v51 }
 0x1de   :  { %v688_v52 = vpop.f32.mrf.mxu2 }
 0x25a   :  { %v725_v54 = vpop.f32.mrf.mxu0 }
 0x25b   :  { %v726_v55 = vadd.f32 %v1056_v53, %v725_v54 }
 0x25d   :  { %v729_v56 = vpack.c.bf16 %v726_v55, %v726_v55 }
 0x25f   :  { %730 = vst [vmem:[%s1332_s9] sm:$0xf] %v729_v56 }
 0x262   :  { %v727_v57 = vpop.f32.mrf.mxu0 }

</bundles_post_ra>
